<compile_context>
chip_gen: v5e
topology: v5e:2x2
jax: 0.10.0
libtpu: 0.0.40
codegen_flags: <defaults>
</compile_context>

<pallas_src>
import functools

import jax
import jax.numpy as jnp
from jax.experimental import pallas as pl
from jax.experimental.pallas import tpu as pltpu

_HI_PREC = jax.lax.Precision.HIGHEST


def _round_up(n, m):
    return ((n + m - 1) // m) * m


def _cdiv(a, b):
    return (a + b - 1) // b


# ---------------------------------------------------------------------------
# Parameter packing: one VMEM-resident (hidden, L) f32 buffer.
# ---------------------------------------------------------------------------
def pack_params(params):
    """Pack ((w,b) x 4) (PyTorch (out,in) weight layout, 1-D biases) into a
    single (hidden, L) f32 buffer + static lane offsets."""
    (w1, b1), (w2, b2), (w3, b3), (w4, b4) = params
    hidden, in_size = w1.shape
    out_size = w4.shape[0]
    assert w2.shape == (hidden, hidden) and w3.shape == (hidden, hidden)
    assert w4.shape == (out_size, hidden)
    assert out_size <= hidden, "packing assumes out_size <= hidden"

    o_w2 = 0
    o_w3 = _round_up(hidden, 128)
    o_w1 = o_w3 + _round_up(hidden, 128)
    o_w4t = o_w1 + in_size
    o_b1 = o_w4t + out_size
    o_b2 = o_b1 + 1
    o_b3 = o_b2 + 1
    o_b4 = o_b3 + 1
    lanes = _round_up(o_b4 + 1, 128)

    buf = jnp.zeros((hidden, lanes), jnp.float32)
    buf = buf.at[:, o_w2:o_w2 + hidden].set(w2.astype(jnp.float32))
    buf = buf.at[:, o_w3:o_w3 + hidden].set(w3.astype(jnp.float32))
    buf = buf.at[:, o_w1:o_w1 + in_size].set(w1.astype(jnp.float32))
    buf = buf.at[:, o_w4t:o_w4t + out_size].set(w4.T.astype(jnp.float32))
    buf = buf.at[:, o_b1].set(b1.reshape(hidden).astype(jnp.float32))
    buf = buf.at[:, o_b2].set(b2.reshape(hidden).astype(jnp.float32))
    buf = buf.at[:, o_b3].set(b3.reshape(hidden).astype(jnp.float32))
    buf = buf.at[:out_size, o_b4].set(b4.reshape(out_size).astype(jnp.float32))

    offs = dict(w2=o_w2, w3=o_w3, w1=o_w1, w4t=o_w4t,
                b1=o_b1, b2=o_b2, b3=o_b3, b4=o_b4)
    return buf, offs, (in_size, hidden, out_size)


# ---------------------------------------------------------------------------
# Kernel
# ---------------------------------------------------------------------------
def _make_kernel(in_size, hidden, out_size, offs, sub, nsub):
    o_w2, o_w3, o_w1 = offs["w2"], offs["w3"], offs["w1"]
    o_w4t, o_b1, o_b2, o_b3, o_b4 = (offs["w4t"], offs["b1"], offs["b2"],
                                     offs["b3"], offs["b4"])

    def kernel(x_ref, p_ref, o_ref):
        # Single packed parameter load (stays VMEM-resident across the grid).
        P = p_ref[...]
        w2 = P[:, o_w2:o_w2 + hidden]            # (hidden, hidden)
        w3 = P[:, o_w3:o_w3 + hidden]            # (hidden, hidden)
        w1 = P[:, o_w1:o_w1 + in_size]           # (hidden, in_size)
        w4t = P[:, o_w4t:o_w4t + out_size]       # (hidden, out_size)
        b1 = P[:, o_b1:o_b1 + 1]                 # (hidden, 1)
        b2 = P[:, o_b2:o_b2 + 1]
        b3 = P[:, o_b3:o_b3 + 1]
        b4 = P[0:out_size, o_b4:o_b4 + 1]        # (out_size, 1)

        def sub_block(j, carry):
            c0 = pl.multiple_of(j * sub, 128)
            xs = x_ref[:, pl.ds(c0, sub)]        # (in_size, sub)

            # Layer 1: K = in_size (tiny) -> VPU broadcast multiply-accumulate.
            if in_size <= 8:
                h = w1[:, 0:1] * xs[0:1, :]
                for k in range(1, in_size):
                    h = h + w1[:, k:k + 1] * xs[k:k + 1, :]
                h = jnp.tanh(h + b1)
            else:
                h = jnp.tanh(jnp.dot(w1, xs, preferred_element_type=jnp.float32,
                                     precision=_HI_PREC) + b1)

            # Layers 2 & 3: 32x32 contractions -> MXU.
            h = jnp.tanh(jnp.dot(w2, h, preferred_element_type=jnp.float32,
                                 precision=_HI_PREC) + b2)
            h = jnp.tanh(jnp.dot(w3, h, preferred_element_type=jnp.float32,
                                 precision=_HI_PREC) + b3)

            # Layer 4: M = out_size (tiny) -> VPU multiply + sublane reduce.
            if out_size == 1:
                out = jnp.sum(w4t * h, axis=0, keepdims=True) + b4
            else:
                out = jax.lax.dot_general(
                    w4t, h, (((0,), (0,)), ((), ())),
                    preferred_element_type=jnp.float32,
                    precision=_HI_PREC) + b4

            o_ref[:, pl.ds(c0, sub)] = out.astype(o_ref.dtype)
            return carry

        # Unrolled inner loop over lane sub-blocks: independent chains fill the
        # MXU and EUP pipelines and bound vreg live ranges.
        jax.lax.fori_loop(0, nsub, sub_block, 0, unroll=True)

    return kernel


# ---------------------------------------------------------------------------
# Tiling choices
# ---------------------------------------------------------------------------
def _choose_tiling(B, tb_max):
    tb_max = max(128, (tb_max // 128) * 128)
    b_pad128 = _round_up(B, 128)              # pad only to the lane width
    # Guarantee >= 2 tiles when there is enough batch to split, so v7x's
    # second TensorCore gets work ("parallel" grid axis).
    min_tiles = 2 if b_pad128 >= 256 else 1
    tiles = max(min_tiles, _cdiv(b_pad128, tb_max))
    tb = _round_up(_cdiv(b_pad128, tiles), 128)
    tiles = max(_cdiv(b_pad128, tb), min_tiles)
    b_pad = tb * tiles                        # waste bounded by ~tiles*128 lanes
    return tb, tiles, b_pad


def _pick_sub(tb):
    for s in (512, 384, 256, 128):
        if tb % s == 0:
            return s
    return tb


# ---------------------------------------------------------------------------
# Public forward
# ---------------------------------------------------------------------------
def neural_net_forward(x, params, *, feature_major=False, tb_max=4096,
                       xla_fallback_batch=512):
    """Forward pass of NeuralNet.

    x: (B, in_size) if feature_major=False, else (in_size, B) (preferred: no
       HBM transpose needed).  Returns (B, output_size) float32.
    params: ((w1,b1),(w2,b2),(w3,b3),(w4,b4)) with w in PyTorch (out,in)
       layout and 1-D biases.
    """
    (w1, _), _, _, (w4, _) = params
    hidden, in_size = w1.shape
    out_size = w4.shape[0]

    if feature_major:
        assert x.shape[0] == in_size
        B = x.shape[1]
    else:
        B = x.shape[0]
        assert x.shape[1] == in_size

    # Small-batch fast path: a single fused XLA op beats pallas_call launch +
    # DMA setup + padding waste at tiny B.
    if B < xla_fallback_batch:
        xb = x.T if feature_major else x
        return reference_forward(xb.astype(jnp.float32), params)

    x_fm = x if feature_major else x.T   # prefer feature-major upstream
    x_fm = x_fm.astype(jnp.float32)

    tb, tiles, b_pad = _choose_tiling(B, tb_max)
    if b_pad != B:
        x_fm = jnp.pad(x_fm, ((0, 0), (0, b_pad - B)))

    packed, offs, _ = pack_params(params)
    sub = _pick_sub(tb)
    nsub = tb // sub
    kernel = _make_kernel(in_size, hidden, out_size, offs, sub, nsub)

    out_fm = pl.pallas_call(
        kernel,
        out_shape=jax.ShapeDtypeStruct((out_size, b_pad), jnp.float32),
        grid_spec=pltpu.PrefetchScalarGridSpec(
            num_scalar_prefetch=0,
            grid=(tiles,),
            in_specs=[
                pl.BlockSpec((in_size, tb), lambda i: (0, i)),
                pl.BlockSpec(packed.shape, lambda i: (0, 0)),   # VMEM-resident
            ],
            out_specs=pl.BlockSpec((out_size, tb), lambda i: (0, i)),
        ),
        compiler_params=pltpu.CompilerParams(
            dimension_semantics=("parallel",),        # megacore sharding on v7x
            vmem_limit_bytes=32 * 1024 * 1024,
        ),
    )(x_fm, packed)

    return out_fm[:, :B].T


# ---------------------------------------------------------------------------
# Initialization (matches the PyTorch module) and reference
# ---------------------------------------------------------------------------
def xavier_uniform(key, out_features, in_features):
    limit = jnp.sqrt(6.0 / (in_features + out_features))
    return jax.random.uniform(key, (out_features, in_features), jnp.float32,
                              -limit, limit)


def init_params(key, input_size, hidden_size, output_size):
    k1, k2, k3, k4 = jax.random.split(key, 4)
    w1 = xavier_uniform(k1, hidden_size, input_size)
    w2 = xavier_uniform(k2, hidden_size, hidden_size)
    w3 = xavier_uniform(k3, hidden_size, hidden_size)
    w4 = xavier_uniform(k4, output_size, hidden_size)
    # PyTorch module does `bias.data.fill_(0.0)` -> zero biases are faithful.
    b1 = jnp.zeros((hidden_size,), jnp.float32)
    b2 = jnp.zeros((hidden_size,), jnp.float32)
    b3 = jnp.zeros((hidden_size,), jnp.float32)
    b4 = jnp.zeros((output_size,), jnp.float32)
    return ((w1, b1), (w2, b2), (w3, b3), (w4, b4))


def reference_forward(x, params):
    (w1, b1), (w2, b2), (w3, b3), (w4, b4) = params
    h = jnp.tanh(jnp.dot(x, w1.T, precision=_HI_PREC) + b1)
    h = jnp.tanh(jnp.dot(h, w2.T, precision=_HI_PREC) + b2)
    h = jnp.tanh(jnp.dot(h, w3.T, precision=_HI_PREC) + b3)
    return jnp.dot(h, w4.T, precision=_HI_PREC) + b4


# ---------------------------------------------------------------------------
# Demo / correctness check
# ---------------------------------------------------------------------------
if __name__ == "__main__":
    # wave1D PINN-style setup: input = (x, t) coordinates -> scalar wave field.
    input_size, hidden_size, output_size = 2, 32, 1

    key = jax.random.PRNGKey(0)
    kx1, kx2, kp = jax.random.split(key, 3)
    params = init_params(kp, input_size, hidden_size, output_size)

    # Collocation points generated feature-major upstream -> no wrapper x.T.
    # (xla_fallback_batch=0 forces the Pallas kernel even at tiny batch.)
    fwd = jax.jit(functools.partial(neural_net_forward, feature_major=True,
                                    xla_fallback_batch=0))
    x1 = jax.random.normal(kx1, (input_size, 8), jnp.float32)     # (in, B=8)
    out1 = jax.block_until_ready(fwd(x1, params))
    ref1 = reference_forward(x1.T, params)
    assert out1.shape == (8, output_size)
    assert jnp.allclose(out1, ref1, atol=1e-5, rtol=1e-5)

    # Non-128-multiple batch with a small tile cap: exercises 128-padding,
    # multi-tile grid (>=2 tiles for v7x) and the sub-block loop.
    fwd2 = jax.jit(functools.partial(neural_net_forward, feature_major=True,
                                     xla_fallback_batch=0, tb_max=256))
    x2 = jax.random.normal(kx2, (input_size, 600), jnp.float32)   # (in, B=600)
    out2 = jax.block_until_ready(fwd2(x2, params))
    ref2 = reference_forward(x2.T, params)
    assert out2.shape == (600, output_size)
    assert jnp.allclose(out2, ref2, atol=1e-5, rtol=1e-5)

    print("KERNEL_OK")
</pallas_src>

<mosaic_0001>
module attributes {stable_mosaic.version = 11 : i64} {
  func.func @kernel(%arg0: i32, %arg1: memref<2x128xf32, #tpu.memory_space<vmem>>, %arg2: memref<32x384xf32, #tpu.memory_space<vmem>>, %arg3: memref<1x128xf32, #tpu.memory_space<vmem>>) attributes {dimension_semantics = [#tpu.dimension_semantics<parallel>], iteration_bounds = array<i64: 1>, scalar_prefetch = 0 : i64, scratch_operands = 0 : i64, tpu.core_type = #tpu.core_type<tc>, window_params = [{transform_indices = @transform_0, window_bounds = array<i64: 2, 128>}, {pipeline_mode = #tpu.pipeline_mode<synchronous>, transform_indices = @transform_1, window_bounds = array<i64: 32, 384>}, {transform_indices = @transform_2, window_bounds = array<i64: 1, 128>}]} {
    %c0 = arith.constant 0 : index
    %c0_0 = arith.constant 0 : index
    %0 = vector.load %arg2[%c0, %c0_0] : memref<32x384xf32, #tpu.memory_space<vmem>>, vector<32x384xf32>
    %1 = vector.extract_strided_slice %0 {offsets = [0, 0], sizes = [32, 32], strides = [1, 1]} : vector<32x384xf32> to vector<32x32xf32>
    %2 = vector.extract_strided_slice %0 {offsets = [0, 128], sizes = [32, 32], strides = [1, 1]} : vector<32x384xf32> to vector<32x32xf32>
    %3 = vector.extract_strided_slice %0 {offsets = [0, 256], sizes = [32, 2], strides = [1, 1]} : vector<32x384xf32> to vector<32x2xf32>
    %4 = vector.extract_strided_slice %0 {offsets = [0, 258], sizes = [32, 1], strides = [1, 1]} : vector<32x384xf32> to vector<32x1xf32>
    %5 = vector.extract_strided_slice %0 {offsets = [0, 259], sizes = [32, 1], strides = [1, 1]} : vector<32x384xf32> to vector<32x1xf32>
    %6 = vector.extract_strided_slice %0 {offsets = [0, 260], sizes = [32, 1], strides = [1, 1]} : vector<32x384xf32> to vector<32x1xf32>
    %7 = vector.extract_strided_slice %0 {offsets = [0, 261], sizes = [32, 1], strides = [1, 1]} : vector<32x384xf32> to vector<32x1xf32>
    %8 = vector.extract_strided_slice %0 {offsets = [0, 262], sizes = [1, 1], strides = [1, 1]} : vector<32x384xf32> to vector<1x1xf32>
    %c0_i32 = arith.constant 0 : i32
    %c128_i32 = arith.constant 128 : i32
    %9 = arith.muli %c0_i32, %c128_i32 : i32
    %10 = tpu.assume_multiple %9, 128 : i32
    %c0_1 = arith.constant 0 : index
    %11 = arith.index_cast %10 : i32 to index
    %12 = vector.load %arg1[%c0_1, %11] : memref<2x128xf32, #tpu.memory_space<vmem>>, vector<2x128xf32>
    %13 = vector.extract_strided_slice %3 {offsets = [0, 0], sizes = [32, 1], strides = [1, 1]} : vector<32x2xf32> to vector<32x1xf32>
    %14 = vector.extract_strided_slice %12 {offsets = [0, 0], sizes = [1, 128], strides = [1, 1]} : vector<2x128xf32> to vector<1x128xf32>
    %15 = vector.broadcast %13 : vector<32x1xf32> to vector<32x128xf32>
    %16 = vector.broadcast %14 : vector<1x128xf32> to vector<32x128xf32>
    %17 = arith.mulf %15, %16 : vector<32x128xf32>
    %18 = vector.extract_strided_slice %3 {offsets = [0, 1], sizes = [32, 1], strides = [1, 1]} : vector<32x2xf32> to vector<32x1xf32>
    %19 = vector.extract_strided_slice %12 {offsets = [1, 0], sizes = [1, 128], strides = [1, 1]} : vector<2x128xf32> to vector<1x128xf32>
    %20 = vector.broadcast %18 : vector<32x1xf32> to vector<32x128xf32>
    %21 = vector.broadcast %19 : vector<1x128xf32> to vector<32x128xf32>
    %22 = arith.mulf %20, %21 : vector<32x128xf32>
    %23 = arith.addf %17, %22 : vector<32x128xf32>
    %24 = vector.broadcast %5 : vector<32x1xf32> to vector<32x128xf32>
    %25 = arith.addf %23, %24 : vector<32x128xf32>
    %26 = math.tanh %25 : vector<32x128xf32>
    %cst = arith.constant dense<0.000000e+00> : vector<32x128xf32>
    %27 = tpu.matmul %1, %26, %cst {dimension_numbers = #tpu.dot_dimension_numbers<[1], [0], [0], [1], [0, 0, 1, 1], [], []>, precision = #tpu.contract_precision<fp32>} : vector<32x32xf32>, vector<32x128xf32>, vector<32x128xf32> -> vector<32x128xf32>
    %28 = vector.broadcast %6 : vector<32x1xf32> to vector<32x128xf32>
    %29 = arith.addf %27, %28 : vector<32x128xf32>
    %30 = math.tanh %29 : vector<32x128xf32>
    %cst_2 = arith.constant dense<0.000000e+00> : vector<32x128xf32>
    %31 = tpu.matmul %2, %30, %cst_2 {dimension_numbers = #tpu.dot_dimension_numbers<[1], [0], [0], [1], [0, 0, 1, 1], [], []>, precision = #tpu.contract_precision<fp32>} : vector<32x32xf32>, vector<32x128xf32>, vector<32x128xf32> -> vector<32x128xf32>
    %32 = vector.broadcast %7 : vector<32x1xf32> to vector<32x128xf32>
    %33 = arith.addf %31, %32 : vector<32x128xf32>
    %34 = math.tanh %33 : vector<32x128xf32>
    %35 = vector.broadcast %4 : vector<32x1xf32> to vector<32x128xf32>
    %36 = arith.mulf %35, %34 : vector<32x128xf32>
    %cst_3 = arith.constant dense<0.000000e+00> : vector<128xf32>
    %37 = vector.multi_reduction <add>, %36, %cst_3 [0] : vector<32x128xf32> to vector<128xf32>
    %38 = vector.shape_cast %37 : vector<128xf32> to vector<1x128xf32>
    %39 = vector.broadcast %8 : vector<1x1xf32> to vector<1x128xf32>
    %40 = arith.addf %38, %39 : vector<1x128xf32>
    %c0_4 = arith.constant 0 : index
    %41 = arith.index_cast %10 : i32 to index
    %42 = vector.load %arg3[%c0_4, %41] : memref<1x128xf32, #tpu.memory_space<vmem>>, vector<1x128xf32>
    tpu.vector_store %arg3[%c0_4, %41], %40 {strides = array<i32>} : memref<1x128xf32, #tpu.memory_space<vmem>>, vector<1x128xf32>,
    %c1_i32 = arith.constant 1 : i32
    return
  }
  func.func @transform_0(%arg0: i32) -> (i32, i32) {
    %c0_i32 = arith.constant 0 : i32
    %c0_i32_0 = arith.constant 0 : i32
    return %c0_i32, %arg0 : i32, i32
  }
  func.func @transform_1(%arg0: i32) -> (i32, i32) {
    %c0_i32 = arith.constant 0 : i32
    %c0_i32_0 = arith.constant 0 : i32
    %c0_i32_1 = arith.constant 0 : i32
    return %c0_i32, %c0_i32_0 : i32, i32
  }
  func.func @transform_2(%arg0: i32) -> (i32, i32) {
    %c0_i32 = arith.constant 0 : i32
    %c0_i32_0 = arith.constant 0 : i32
    return %c0_i32, %arg0 : i32, i32
  }
}

</mosaic_0001>

<bundles_post_ra>
// kernel: neural_net_forward.1
= control target key start
LH: loop header
LB: loop body
LE: loop exit
PB: predicated region body
PF: predicated region fallthrough
CT: control target
= control target key end

     0   :  { %v809_v0 = vmov 0   ;;  %v810_v4 = vmov 1   ;;  %v811_v6 = vmov 3   ;;  %vm114_vm0 = vcmask 261120   ;;  %s974_s1 = inlined_call_operand.vmem [shape: f32[32,384], index: 1, kind: input, shape index: {}]   ;;  %s975_s0 = inlined_call_operand.vmem [shape: f32[2,128], index: 0, kind: input, shape index: {}]   ;;  %s976_s2 = inlined_call_operand.vmem [shape: f32[1,128], index: 2, kind: output, shape index: {}]  }
   0x1   :  { %769 = vset.pattern.permute.xlu2 %v809_v0  ;;  %767 = vset.pattern.permute.xlu1 %v809_v0  ;;  %v834_v1 = vld [vmem:[%s974_s1 + $0x58] sm:$0xff]  ;;  %v839_v2 = vld [vmem:[%s974_s1 + $0x40] sm:$0xff]  ;;  %v844_v3 = vld [vmem:[%s974_s1 + $0x28] sm:$0xff]  ;;  %v812_v45 = vmov 4  }
   0x2   :  { %765 = vset.pattern.permute.xlu0 %v809_v0  ;;  %36 = vperm.xlu1 %767, %v839_v2   ;;  %v855_v5 = vld [vmem:[%s974_s1 + $0x10] sm:$0xff]  ;;  %v23_v11 = vld [vmem:[%s975_s0] sm:$0x3]  ;;  %v14_v37 = vld [vmem:[%s974_s1 + $0x18] sm:$0xff] }
   0x3   :  { %41 = vperm.xlu0 %765, %v834_v1   ;;  %31 = vperm.xlu2 %769, %v844_v3   ;;  %v44_v13 = vperm.slane %v23_v11, 0  ;;  %v65_v14 = vperm.slane %v23_v11, 1  ;;  %v11_v26 = vld [vmem:[%s974_s1] sm:$0xff]  ;;  %v119_v47 = vsel %vm114_vm0, %v14_v37, 0  ;;  %v17_v53 = vld [vmem:[%s974_s1 + $0x30] sm:$0xff] }
   0x4   :  { %v116_v29 = vsel %vm114_vm0, %v11_v26, 0  ;;  %v886_v51 = vand.u32 4294901760, %v119_v47  ;;  %v122_v62 = vsel %vm114_vm0, %v17_v53, 0 }
   0x5   :  { %v870_v34 = vand.u32 4294901760, %v116_v29 }
   0x6   :  { %v156_v58 = vsub.f32 %v119_v47, %v886_v51 }
   0x7   :  { %v148_v44 = vsub.f32 %v116_v29, %v870_v34 }
   0x9   :  { %v149_v50 = vand.u32 4294901760, %v148_v44 }
   0xa   :  { %768 = vset.pattern.permute.xlu1 %v810_v4 }
   0xb   :  { %766 = vset.pattern.permute.xlu0 %v810_v4  ;;  %770 = vset.pattern.permute.xlu2 %v810_v4  ;;  %v150_v57 = vsub.f32 %v148_v44, %v149_v50 }
   0xc   :  { %62 = vperm.xlu0 %766, %v834_v1   ;;  %58 = vperm.xlu1 %768, %v839_v2  }
   0xd   :  { %54 = vperm.xlu2 %770, %v844_v3  }
  0x14   :  { %771 = vset.pattern.permute.xlu1 %v811_v6  ;;  %50 = vperm.xlu0 %766, %v855_v5  }
  0x15   :  { %772 = vset.pattern.permute.xlu2 %v809_v0  ;;  %87 = vperm.xlu1 %771, %v834_v1  }
  0x16   :  { %26 = vperm.xlu2 %772, %v855_v5  }
  0x1c   :  { %774 = vset.pattern.permute.xlu0 %v811_v6 }
  0x1d   :  { %83 = vperm.xlu1 %771, %v839_v2   ;;  %75 = vperm.xlu0 %774, %v855_v5  }
  0x1e   :  { %773 = vset.pattern.permute.xlu2 %v811_v6  ;;  %v151_v6 = vand.u32 4294901760, %v150_v57 }
  0x1f   :  { %79 = vperm.xlu2 %773, %v844_v3  }
  0x25   :  { %775 = vset.pattern.permute.xlu1 %v812_v45 }
  0x26   :  { %111 = vperm.xlu1 %775, %v834_v1  }
  0x27   :  { %776 = vset.pattern.permute.xlu2 %v812_v45 }
  0x28   :  { %107 = vperm.xlu2 %776, %v839_v2  }
  0x2e   :  { %103 = vperm.xlu1 %775, %v844_v3  }
  0x30   :  { %99 = vperm.xlu2 %776, %v855_v5  }
  0x5d   :  { %v32_v7 = vpop.permute.xlu2 %31 }
  0x5e   :  { %v46_v15 = vmul.f32 %v44_v13, %v32_v7 }
  0x67   :  { %v55_v8 = vpop.permute.xlu2 %54 }
  0x68   :  { %v67_v16 = vmul.f32 %v65_v14, %v55_v8  ;;  %v157_v8 = vand.u32 4294901760, %v156_v58 }
  0x6a   :  { %v71_v19 = vadd.f32 %v67_v16, %v46_v15  ;;  %v158_v15 = vsub.f32 %v156_v58, %v157_v8 }
  0x70   :  { %v27_v12 = vpop.permute.xlu2 %26 }
  0x71   :  { %v45_v30 = vmul.f32 %v44_v13, %v27_v12  ;;  %v20_v12 = vld [vmem:[%s974_s1 + $0x48] sm:$0xff] }
  0x74   :  { %v37_v9 = vpop.permute.xlu1 %36 }
  0x75   :  { %v42_v10 = vpop.permute.xlu0 %41  ;;  %v47_v33 = vmul.f32 %v44_v13, %v37_v9  ;;  %v163_v9 = vand.u32 4294901760, %v122_v62 }
  0x76   :  { %v48_v22 = vmul.f32 %v44_v13, %v42_v10 }
  0x77   :  { %v164_v16 = vsub.f32 %v122_v62, %v163_v9 }
  0x79   :  { %v80_v20 = vpop.permute.xlu2 %79 }
  0x7a   :  { %v91_v23 = vadd.f32 %v80_v20, %v71_v19  ;;  %v125_v19 = vsel %vm114_vm0, %v20_v12, 0 }
  0x7c   :  { %785 = vtanh.f32 %v91_v23  ;;  %v171_v23 = vand.u32 4294901760, %v125_v19 }
  0x7e   :  { %v63_v17 = vpop.permute.xlu0 %62  ;;  %v59_v18 = vpop.permute.xlu1 %58  ;;  %v172_v26 = vsub.f32 %v125_v19, %v171_v23 }
  0x7f   :  { %v69_v21 = vmul.f32 %v65_v14, %v63_v17  ;;  %v68_v31 = vmul.f32 %v65_v14, %v59_v18 }
  0x81   :  { %v73_v25 = vadd.f32 %v69_v21, %v48_v22  ;;  %v72_v35 = vadd.f32 %v68_v31, %v47_v33  ;;  %v159_v21 = vand.u32 4294901760, %v158_v15  ;;  %v165_v22 = vand.u32 4294901760, %v164_v16 }
  0x82   :  { %v786_v38 = vpop.eup %785 }
  0x83   :  { %v884_v49 = vand.u32 4294901760, %v786_v38 }
  0x85   :  { %v205_v55 = vsub.f32 %v786_v38, %v884_v49 }
  0x86   :  { %v51_v24 = vpop.permute.xlu0 %50 }
  0x87   :  { %v88_v27 = vpop.permute.xlu1 %87  ;;  %v66_v32 = vmul.f32 %v65_v14, %v51_v24  ;;  %v206_v4 = vand.u32 4294901760, %v205_v55 }
  0x88   :  { %v93_v28 = vadd.f32 %v88_v27, %v73_v25  ;;  %v166_v25 = vsub.f32 %v164_v16, %v165_v22 }
  0x89   :  { %v70_v36 = vadd.f32 %v66_v32, %v45_v30  ;;  %v207_v14 = vsub.f32 %v205_v55, %v206_v4 }
  0x8a   :  { %787 = vtanh.f32 %v93_v28  ;;  %v167_v27 = vand.u32 4294901760, %v166_v25  ;;  %v173_v28 = vand.u32 4294901760, %v172_v26 }
  0x8b   :  { %v208_v20 = vand.u32 4294901760, %v207_v14 }
  0x8c   :  { %v174_v29 = vsub.f32 %v172_v26, %v173_v28 }
  0x8e   :  { %v175_v30 = vand.u32 4294901760, %v174_v29  ;;  %v15_v29 = vld [vmem:[%s974_s1 + $0x20] sm:$0xff] }
  0x8f   :  { %v84_v39 = vpop.permute.xlu1 %83  ;;  %v76_v40 = vpop.permute.xlu0 %75 }
  0x90   :  { %v788_v41 = vpop.eup %787  ;;  %v92_v42 = vadd.f32 %v84_v39, %v72_v35  ;;  %v90_v43 = vadd.f32 %v76_v40, %v70_v36 }
  0x91   :  { %v876_v46 = vand.u32 4294901760, %v788_v41 }
  0x92   :  { %789 = vtanh.f32 %v92_v42  ;;  %v108_v42 = vpop.permute.xlu2 %107 }
  0x93   :  { %791 = vtanh.f32 %v90_v43  ;;  %140 = vmatpush.msra.mxu0 %v876_v46  ;;  %291 = vmatpush.msra.mxu3 %v876_v46  ;;  %v193_v48 = vsub.f32 %v788_v41, %v876_v46 }
  0x95   :  { %247 = vmatpush.msra.mxu2 %v193_v48  ;;  %v194_v52 = vand.u32 4294901760, %v193_v48 }
  0x97   :  { %v195_v54 = vsub.f32 %v193_v48, %v194_v52 }
  0x98   :  { %v790_v56 = vpop.eup %789  ;;  %v112_v40 = vpop.permute.xlu1 %111 }
  0x99   :  { %v792_v59 = vpop.eup %791  ;;  %v141_v60 = vand.u32 4294901760, %v790_v56  ;;  %v196_v61 = vand.u32 4294901760, %v195_v54 }
  0x9a   :  { %v145_v63 = vand.u32 4294901760, %v792_v59  ;;  %v100_v47 = vpop.permute.xlu2 %99 }
  0x9b   :  { %142 = vmatpush.msra.mxu0 %v141_v60  ;;  %197 = vmatpush.msra.mxu1 %v196_v61  ;;  %v199_v0 = vsub.f32 %v790_v56, %v141_v60 }
  0x9c   :  { %293 = vmatpush.msra.mxu3 %v141_v60  ;;  %v211_v7 = vsub.f32 %v792_v59, %v145_v63 }
  0x9d   :  { %144 = vmatpush.msra.mxu0 %v884_v49  ;;  %250 = vmatpush.msra.mxu2 %v199_v0  ;;  %v200_v10 = vand.u32 4294901760, %v199_v0 }
  0x9e   :  { %295 = vmatpush.msra.mxu3 %v884_v49  ;;  %v212_v11 = vand.u32 4294901760, %v211_v7 }
  0x9f   :  { %146 = vmatpush.msra.mxu0 %v145_v63  ;;  %253 = vmatpush.msra.mxu2 %v205_v55  ;;  %v201_v13 = vsub.f32 %v199_v0, %v200_v10 }
  0xa0   :  { %297 = vmatpush.msra.mxu3 %v145_v63  ;;  %152 = vmatmul.f32.vlgmr.msra.gmra.mxu0 %v151_v6  ;;  %v213_v18 = vsub.f32 %v211_v7, %v212_v11  ;;  %v104_v45 = vpop.permute.xlu1 %103 }
  0xa1   :  { %338 = vmatpush.msrb.mxu0 %v194_v52  ;;  %256 = vmatpush.msra.mxu2 %v211_v7  ;;  %v202_v17 = vand.u32 4294901760, %v201_v13 }
  0xa2   :  { %259 = vmatmul.f32.vlgmr.msra.gmra.mxu2 %v148_v44  ;;  %301 = vmatmul.f32.vlgmr.msra.gmra.mxu3 %v149_v50  ;;  %v214_v24 = vand.u32 4294901760, %v213_v18  ;;  %v12_v18 = vld [vmem:[%s974_s1 + $0x8] sm:$0xff] }
  0xa3   :  { %342 = vmatpush.msrb.mxu0 %v200_v10  ;;  %203 = vmatpush.msra.mxu1 %v202_v17 }
  0xa5   :  { %346 = vmatpush.msrb.mxu0 %v206_v4  ;;  %209 = vmatpush.msra.mxu1 %v208_v20 }
  0xa7   :  { %350 = vmatpush.msrb.mxu0 %v212_v11  ;;  %215 = vmatpush.msra.mxu1 %v214_v24 }
  0xa8   :  { %160 = vmatmul.f32.gmra.mxu0 %v159_v21  ;;  %217 = vmatmul.f32.vlgmr.msra.gmra.mxu1 %v870_v34  ;;  %v426_v21 = vsel %vm114_vm0, %v12_v18, 0 }
  0xa9   :  { %381 = vmatpush.msrb.mxu1 %v876_v46 }
  0xaa   :  { %264 = vmatmul.f32.gmra.mxu2 %v156_v58  ;;  %307 = vmatmul.f32.gmra.mxu3 %v157_v8 }
  0xab   :  { %383 = vmatpush.msrb.mxu1 %v141_v60 }
  0xad   :  { %385 = vmatpush.msrb.mxu1 %v884_v49 }
  0xaf   :  { %387 = vmatpush.msrb.mxu1 %v145_v63 }
  0xb0   :  { %168 = vmatmul.f32.gmra.mxu0 %v167_v27  ;;  %221 = vmatmul.f32.gmra.mxu1 %v886_v51 }
  0xb2   :  { %269 = vmatmul.f32.gmra.mxu2 %v164_v16  ;;  %313 = vmatmul.f32.gmra.mxu3 %v165_v22 }
  0xb8   :  { %176 = vmatmul.f32.gmra.mxu0 %v175_v30  ;;  %225 = vmatmul.f32.gmra.mxu1 %v163_v9 }
  0xba   :  { %274 = vmatmul.f32.gmra.mxu2 %v172_v26  ;;  %319 = vmatmul.f32.gmra.mxu3 %v173_v28  ;;  %v914_v26 = vand.u32 4294901760, %v426_v21 }
  0xc0   :  { %229 = vmatmul.f32.gmra.mxu1 %v171_v23  ;;  %352 = vmatmul.f32.vlgmr.msrb.gmra.mxu0 %v870_v34 }
  0xc8   :  { %356 = vmatmul.f32.gmra.mxu0 %v886_v51  ;;  %389 = vmatmul.f32.vlgmr.msrb.gmra.mxu1 %v870_v34 }
  0xd0   :  { %360 = vmatmul.f32.gmra.mxu0 %v163_v9  ;;  %393 = vmatmul.f32.gmra.mxu1 %v886_v51 }
  0xd8   :  { %364 = vmatmul.f32.gmra.mxu0 %v171_v23  ;;  %397 = vmatmul.f32.gmra.mxu1 %v163_v9 }
  0xe0   :  { %401 = vmatmul.f32.gmra.mxu1 %v171_v23 }
 0x11d   :  { %v153_v31 = vpop.f32.mrf.mxu0 }
 0x11e   :  { %v154_v52 = vadd.f32 %v153_v31, %v100_v47  ;;  %v458_v31 = vsub.f32 %v426_v21, %v914_v26 }
 0x125   :  { %v161_v32 = vpop.f32.mrf.mxu0  ;;  %v218_v33 = vpop.f32.mrf.mxu1 }
 0x126   :  { %v260_v37 = vpop.f32.mrf.mxu2  ;;  %v302_v41 = vpop.f32.mrf.mxu3  ;;  %v162_v50 = vadd.f32 %v161_v32, %v104_v45  ;;  %v219_v56 = vadd.f32 %v218_v33, %v154_v52  ;;  %v429_v33 = vsel %vm114_vm0, %v15_v29, 0 }
 0x128   :  { %v261_v63 = vadd.f32 %v260_v37, %v219_v56 }
 0x12a   :  { %v303_v8 = vadd.f32 %v302_v41, %v261_v63  ;;  %v929_v41 = vand.u32 4294901760, %v429_v33 }
 0x12d   :  { %v169_v35 = vpop.f32.mrf.mxu0  ;;  %v222_v36 = vpop.f32.mrf.mxu1 }
 0x12e   :  { %v265_v34 = vpop.f32.mrf.mxu2  ;;  %v308_v46 = vpop.f32.mrf.mxu3  ;;  %v170_v51 = vadd.f32 %v169_v35, %v108_v42  ;;  %v223_v54 = vadd.f32 %v222_v36, %v162_v50 }
 0x130   :  { %v266_v59 = vadd.f32 %v265_v34, %v223_v54  ;;  %v18_v34 = vld [vmem:[%s974_s1 + $0x38] sm:$0xff] }
 0x131   :  { %v432_v50 = vsel %vm114_vm0, %v18_v34, 0 }
 0x132   :  { %v309_v0 = vadd.f32 %v308_v46, %v266_v59  ;;  %v813_v46 = vmov 5  }
 0x133   :  { %777 = vset.pattern.permute.xlu0 %v813_v46  ;;  %778 = vset.pattern.permute.xlu1 %v813_v46 }
 0x134   :  { %410 = vperm.xlu0 %777, %v855_v5   ;;  %414 = vperm.xlu1 %778, %v844_v3  }
 0x135   :  { %v177_v38 = vpop.f32.mrf.mxu0  ;;  %v226_v39 = vpop.f32.mrf.mxu1  ;;  %779 = vset.pattern.permute.xlu2 %v813_v46 }
 0x136   :  { %v270_v53 = vpop.f32.mrf.mxu2  ;;  %v227_v55 = vadd.f32 %v226_v39, %v170_v51  ;;  %v314_v57 = vpop.f32.mrf.mxu3  ;;  %v178_v60 = vadd.f32 %v177_v38, %v112_v40  ;;  %v459_v38 = vand.u32 4294901760, %v458_v31  ;;  %418 = vperm.xlu2 %779, %v839_v2  }
 0x138   :  { %v271_v61 = vadd.f32 %v270_v53, %v227_v55  ;;  %v460_v45 = vsub.f32 %v458_v31, %v459_v38 }
 0x13a   :  { %v315_v4 = vadd.f32 %v314_v57, %v271_v61  ;;  %v461_v54 = vand.u32 4294901760, %v460_v45  ;;  %v21_v61 = vld [vmem:[%s974_s1 + $0x50] sm:$0xff] }
 0x13c   :  { %422 = vperm.xlu1 %778, %v834_v1  }
 0x13d   :  { %v230_v43 = vpop.f32.mrf.mxu1  ;;  %v353_v44 = vpop.f32.mrf.mxu0 }
 0x13e   :  { %v231_v6 = vadd.f32 %v230_v43, %v178_v60  ;;  %v275_v7 = vpop.f32.mrf.mxu2  ;;  %v354_v12 = vadd.f32 %v353_v44, %v303_v8  ;;  %v320_v16 = vpop.f32.mrf.mxu3 }
 0x140   :  { %v276_v13 = vadd.f32 %v275_v7, %v231_v6 }
 0x142   :  { %v321_v20 = vadd.f32 %v320_v16, %v276_v13  ;;  %v814_v16 = vmov 2  }
 0x143   :  { %781 = vset.pattern.permute.xlu0 %v814_v16  ;;  %780 = vset.pattern.permute.xlu2 %v814_v16 }
 0x144   :  { %782 = vset.pattern.permute.xlu1 %v814_v16  ;;  %724 = vperm.xlu0 %781, %v844_v3  }
 0x145   :  { %v357_v48 = vpop.f32.mrf.mxu0  ;;  %v390_v49 = vpop.f32.mrf.mxu1  ;;  %728 = vperm.xlu1 %782, %v839_v2   ;;  %720 = vperm.xlu2 %780, %v855_v5  }
 0x146   :  { %v358_v9 = vadd.f32 %v357_v48, %v309_v0  ;;  %v391_v17 = vadd.f32 %v390_v49, %v354_v12  ;;  %v466_v49 = vsub.f32 %v429_v33, %v929_v41 }
 0x148   :  { %v467_v57 = vand.u32 4294901760, %v466_v49 }
 0x14a   :  { %v468_v63 = vsub.f32 %v466_v49, %v467_v57 }
 0x14c   :  { %v469_v7 = vand.u32 4294901760, %v468_v63 }
 0x14d   :  { %v394_v58 = vpop.f32.mrf.mxu1  ;;  %v361_v62 = vpop.f32.mrf.mxu0  ;;  %732 = vperm.xlu2 %780, %v834_v1  }
 0x14e   :  { %v362_v10 = vadd.f32 %v361_v62, %v315_v4  ;;  %v395_v14 = vadd.f32 %v394_v58, %v358_v9  ;;  %v944_v58 = vand.u32 4294901760, %v432_v50  ;;  %v435_v4 = vsel %vm114_vm0, %v21_v61, 0 }
 0x14f   :  { %v481_v9 = vand.u32 4294901760, %v435_v4 }
 0x150   :  { %v474_v0 = vsub.f32 %v432_v50, %v944_v58 }
 0x152   :  { %v475_v8 = vand.u32 4294901760, %v474_v0 }
 0x155   :  { %v398_v11 = vpop.f32.mrf.mxu1  ;;  %v365_v19 = vpop.f32.mrf.mxu0 }
 0x156   :  { %v399_v15 = vadd.f32 %v398_v11, %v362_v10  ;;  %v366_v22 = vadd.f32 %v365_v19, %v321_v20  ;;  %v476_v10 = vsub.f32 %v474_v0, %v475_v8  ;;  %v482_v11 = vsub.f32 %v435_v4, %v481_v9 }
 0x158   :  { %793 = vtanh.f32 %v399_v15  ;;  %v477_v12 = vand.u32 4294901760, %v476_v10  ;;  %v483_v13 = vand.u32 4294901760, %v482_v11 }
 0x159   :  { %795 = vtanh.f32 %v395_v14 }
 0x15a   :  { %797 = vtanh.f32 %v391_v17  ;;  %v484_v14 = vsub.f32 %v482_v11, %v483_v13  ;;  %v815_v17 = vmov 6  }
 0x15b   :  { %783 = vset.pattern.permute.xlu1 %v815_v17  ;;  %784 = vset.pattern.permute.xlu0 %v815_v17 }
 0x15c   :  { %v485_v15 = vand.u32 4294901760, %v484_v14  ;;  %749 = vperm.xlu1 %783, %v855_v5  }
 0x15d   :  { %v402_v23 = vpop.f32.mrf.mxu1 }
 0x15e   :  { %v794_v24 = vpop.eup %793  ;;  %v403_v25 = vadd.f32 %v402_v23, %v366_v22 }
 0x15f   :  { %v796_v27 = vpop.eup %795  ;;  %v916_v28 = vand.u32 4294901760, %v794_v24 }
 0x160   :  { %799 = vtanh.f32 %v403_v25  ;;  %v798_v30 = vpop.eup %797  ;;  %v922_v32 = vand.u32 4294901760, %v796_v27 }
 0x161   :  { %v509_v35 = vsub.f32 %v794_v24, %v916_v28  ;;  %v926_v36 = vand.u32 4294901760, %v798_v30 }
 0x162   :  { %v515_v40 = vsub.f32 %v796_v27, %v922_v32 }
 0x163   :  { %v521_v43 = vsub.f32 %v798_v30, %v926_v36  ;;  %v510_v44 = vand.u32 4294901760, %v509_v35 }
 0x164   :  { %v516_v48 = vand.u32 4294901760, %v515_v40 }
 0x165   :  { %v511_v52 = vsub.f32 %v509_v35, %v510_v44  ;;  %v522_v53 = vand.u32 4294901760, %v521_v43 }
 0x166   :  { %v800_v37 = vpop.eup %799  ;;  %v517_v56 = vsub.f32 %v515_v40, %v516_v48 }
 0x167   :  { %v449_v39 = vand.u32 4294901760, %v800_v37  ;;  %v512_v59 = vand.u32 4294901760, %v511_v52  ;;  %v523_v60 = vsub.f32 %v521_v43, %v522_v53 }
 0x168   :  { %v518_v62 = vand.u32 4294901760, %v517_v56 }
 0x169   :  { %450 = vmatpush.msrb.mxu2 %v449_v39  ;;  %601 = vmatpush.msra.mxu1 %v449_v39  ;;  %v503_v42 = vsub.f32 %v800_v37, %v449_v39  ;;  %v524_v6 = vand.u32 4294901760, %v523_v60 }
 0x16b   :  { %452 = vmatpush.msrb.mxu2 %v916_v28  ;;  %557 = vmatpush.msra.mxu0 %v503_v42  ;;  %v504_v47 = vand.u32 4294901760, %v503_v42 }
 0x16c   :  { %603 = vmatpush.msra.mxu1 %v916_v28 }
 0x16d   :  { %454 = vmatpush.msrb.mxu2 %v922_v32  ;;  %560 = vmatpush.msra.mxu0 %v509_v35  ;;  %v505_v51 = vsub.f32 %v503_v42, %v504_v47 }
 0x16e   :  { %605 = vmatpush.msra.mxu1 %v922_v32 }
 0x16f   :  { %456 = vmatpush.msrb.mxu2 %v926_v36  ;;  %563 = vmatpush.msra.mxu0 %v515_v40  ;;  %v506_v55 = vand.u32 4294901760, %v505_v51 }
 0x170   :  { %607 = vmatpush.msra.mxu1 %v926_v36  ;;  %462 = vmatmul.f32.vlgmr.msrb.gmra.mxu2 %v461_v54 }
 0x171   :  { %648 = vmatpush.msra.mxu2 %v504_v47  ;;  %507 = vmatpush.msrb.mxu3 %v506_v55 }
 0x172   :  { %566 = vmatpush.msra.mxu0 %v521_v43  ;;  %611 = vmatmul.f32.vlgmr.msra.gmra.mxu1 %v459_v38 }
 0x173   :  { %652 = vmatpush.msra.mxu2 %v510_v44  ;;  %569 = vmatmul.f32.vlgmr.msra.gmra.mxu0 %v458_v31 }
 0x174   :  { %513 = vmatpush.msrb.mxu3 %v512_v59 }
 0x175   :  { %656 = vmatpush.msra.mxu2 %v516_v48 }
 0x176   :  { %519 = vmatpush.msrb.mxu3 %v518_v62 }
 0x177   :  { %660 = vmatpush.msra.mxu2 %v522_v53 }
 0x178   :  { %525 = vmatpush.msrb.mxu3 %v524_v6  ;;  %470 = vmatmul.f32.gmra.mxu2 %v469_v7 }
 0x179   :  { %527 = vmatmul.f32.vlgmr.msrb.gmra.mxu3 %v914_v26 }
 0x17a   :  { %691 = vmatpush.msra.mxu3 %v449_v39  ;;  %617 = vmatmul.f32.gmra.mxu1 %v467_v57 }
 0x17b   :  { %574 = vmatmul.f32.gmra.mxu0 %v466_v49 }
 0x17c   :  { %693 = vmatpush.msra.mxu3 %v916_v28 }
 0x17e   :  { %695 = vmatpush.msra.mxu3 %v922_v32 }
 0x180   :  { %697 = vmatpush.msra.mxu3 %v926_v36  ;;  %478 = vmatmul.f32.gmra.mxu2 %v477_v12 }
 0x181   :  { %531 = vmatmul.f32.gmra.mxu3 %v929_v41 }
 0x182   :  { %623 = vmatmul.f32.gmra.mxu1 %v475_v8 }
 0x183   :  { %579 = vmatmul.f32.gmra.mxu0 %v474_v0 }
 0x188   :  { %486 = vmatmul.f32.gmra.mxu2 %v485_v15 }
 0x189   :  { %535 = vmatmul.f32.gmra.mxu3 %v944_v58 }
 0x18a   :  { %629 = vmatmul.f32.gmra.mxu1 %v483_v13 }
 0x18b   :  { %584 = vmatmul.f32.gmra.mxu0 %v482_v11 }
 0x190   :  { %662 = vmatmul.f32.vlgmr.msra.gmra.mxu2 %v914_v26  ;;  %v419_v28 = vpop.permute.xlu2 %418 }
 0x191   :  { %539 = vmatmul.f32.gmra.mxu3 %v481_v9 }
 0x198   :  { %666 = vmatmul.f32.gmra.mxu2 %v929_v41 }
 0x199   :  { %699 = vmatmul.f32.vlgmr.msra.gmra.mxu3 %v914_v26 }
 0x19f   :  { %v721_v6 = vpop.permute.xlu2 %720 }
 0x1a0   :  { %670 = vmatmul.f32.gmra.mxu2 %v944_v58 }
 0x1a1   :  { %703 = vmatmul.f32.gmra.mxu3 %v929_v41 }
 0x1a6   :  { %v415_v26 = vpop.permute.xlu1 %414  ;;  %v411_v27 = vpop.permute.xlu0 %410 }
 0x1a7   :  { %v733_v17 = vpop.permute.xlu2 %732 }
 0x1a8   :  { %674 = vmatmul.f32.gmra.mxu2 %v481_v9 }
 0x1a9   :  { %707 = vmatmul.f32.gmra.mxu3 %v944_v58 }
 0x1ae   :  { %v423_v40 = vpop.permute.xlu1 %422 }
 0x1b1   :  { %711 = vmatmul.f32.gmra.mxu3 %v481_v9 }
 0x1b6   :  { %v725_v7 = vpop.permute.xlu0 %724 }
 0x1b7   :  { %v729_v11 = vpop.permute.xlu1 %728 }
 0x1ef   :  { %v612_v24 = vpop.f32.mrf.mxu1 }
 0x1f0   :  { %v570_v22 = vpop.f32.mrf.mxu0 }
 0x1f3   :  { %v463_v2 = vpop.f32.mrf.mxu2 }
 0x1f4   :  { %v464_v31 = vadd.f32 %v463_v2, %v411_v27 }
 0x1f7   :  { %v618_v29 = vpop.f32.mrf.mxu1 }
 0x1f8   :  { %v575_v25 = vpop.f32.mrf.mxu0 }
 0x1fb   :  { %v471_v18 = vpop.f32.mrf.mxu2 }
 0x1fc   :  { %v528_v3 = vpop.f32.mrf.mxu3  ;;  %v472_v30 = vadd.f32 %v471_v18, %v415_v26 }
 0x1fd   :  { %v529_v37 = vadd.f32 %v528_v3, %v464_v31 }
 0x1ff   :  { %v571_v42 = vadd.f32 %v570_v22, %v529_v37  ;;  %v624_v44 = vpop.f32.mrf.mxu1 }
 0x200   :  { %v580_v38 = vpop.f32.mrf.mxu0 }
 0x201   :  { %v613_v48 = vadd.f32 %v612_v24, %v571_v42  ;;  %v750_v24 = vpop.permute.xlu1 %749 }
 0x203   :  { %v479_v20 = vpop.f32.mrf.mxu2 }
 0x204   :  { %v532_v19 = vpop.f32.mrf.mxu3  ;;  %v480_v33 = vadd.f32 %v479_v20, %v419_v28 }
 0x205   :  { %v533_v35 = vadd.f32 %v532_v19, %v472_v30 }
 0x207   :  { %v576_v41 = vadd.f32 %v575_v25, %v533_v35  ;;  %v630_v60 = vpop.f32.mrf.mxu1 }
 0x208   :  { %v585_v53 = vpop.f32.mrf.mxu0 }
 0x209   :  { %v619_v46 = vadd.f32 %v618_v29, %v576_v41 }
 0x20b   :  { %v487_v23 = vpop.f32.mrf.mxu2 }
 0x20c   :  { %v536_v21 = vpop.f32.mrf.mxu3  ;;  %v488_v45 = vadd.f32 %v487_v23, %v423_v40 }
 0x20d   :  { %v537_v39 = vadd.f32 %v536_v21, %v480_v33 }
 0x20f   :  { %v581_v34 = vadd.f32 %v580_v38, %v537_v39 }
 0x211   :  { %v625_v50 = vadd.f32 %v624_v44, %v581_v34 }
 0x213   :  { %v663_v1 = vpop.f32.mrf.mxu2 }
 0x214   :  { %v540_v5 = vpop.f32.mrf.mxu3  ;;  %v664_v52 = vadd.f32 %v663_v1, %v613_v48 }
 0x215   :  { %v541_v51 = vadd.f32 %v540_v5, %v488_v45 }
 0x217   :  { %v586_v59 = vadd.f32 %v585_v53, %v541_v51 }
 0x219   :  { %v631_v62 = vadd.f32 %v630_v60, %v586_v59 }
 0x21b   :  { %v667_v36 = vpop.f32.mrf.mxu2 }
 0x21c   :  { %v700_v32 = vpop.f32.mrf.mxu3  ;;  %v668_v49 = vadd.f32 %v667_v36, %v619_v46 }
 0x21d   :  { %v701_v56 = vadd.f32 %v700_v32, %v664_v52 }
 0x223   :  { %v671_v47 = vpop.f32.mrf.mxu2 }
 0x224   :  { %v704_v43 = vpop.f32.mrf.mxu3  ;;  %v672_v55 = vadd.f32 %v671_v47, %v625_v50 }
 0x225   :  { %v705_v54 = vadd.f32 %v704_v43, %v668_v49 }
 0x227   :  { %801 = vtanh.f32 %v705_v54 }
 0x228   :  { %803 = vtanh.f32 %v701_v56 }
 0x22b   :  { %v675_v61 = vpop.f32.mrf.mxu2 }
 0x22c   :  { %v708_v57 = vpop.f32.mrf.mxu3  ;;  %v676_v63 = vadd.f32 %v675_v61, %v631_v62 }
 0x22d   :  { %v709_v58 = vadd.f32 %v708_v57, %v672_v55  ;;  %v802_v4 = vpop.eup %801 }
 0x22e   :  { %v804_v9 = vpop.eup %803  ;;  %v736_v12 = vmul.f32 %v802_v4, %v725_v7 }
 0x22f   :  { %805 = vtanh.f32 %v709_v58  ;;  %v735_v13 = vmul.f32 %v804_v9, %v721_v6 }
 0x231   :  { %v739_v15 = vadd.f32 %v736_v12, %v735_v13 }
 0x234   :  { %v712_v0 = vpop.f32.mrf.mxu3 }
 0x235   :  { %v713_v8 = vadd.f32 %v712_v0, %v676_v63  ;;  %v806_v10 = vpop.eup %805 }
 0x236   :  { %v737_v14 = vmul.f32 %v806_v10, %v729_v11 }
 0x237   :  { %807 = vtanh.f32 %v713_v8 }
 0x238   :  { %v740_v2 = vadd.f32 %v739_v15, %v737_v14 }
 0x23d   :  { %v808_v16 = vpop.eup %807 }
 0x23e   :  { %v738_v3 = vmul.f32 %v808_v16, %v733_v17 }
 0x240   :  { %v741_v18 = vadd.f32 %v740_v2, %v738_v3 }
 0x242   :  { %v742_v19 = vrot.slane %v741_v18, 4 }
 0x244   :  { %v743_v20 = vadd.f32 %v742_v19, %v741_v18 }
 0x246   :  { %v744_v21 = vrot.slane %v743_v20, 2 }
 0x248   :  { %v745_v22 = vadd.f32 %v744_v21, %v743_v20 }
 0x24a   :  { %v746_v23 = vrot.slane %v745_v22, 1 }
 0x24c   :  { %v747_v5 = vadd.f32 %v746_v23, %v745_v22 }
 0x24e   :  { %v752_v25 = vadd.f32 %v750_v24, %v747_v5 }
 0x250   :  { %753 = vst [vmem:[%s976_s2] sm:$0x1] %v752_v25 }

</bundles_post_ra>
